<compile_context>
chip_gen: v6e
topology: v6e:2x2x1
jax: 0.10.0
libtpu: 0.0.40
codegen_flags: <defaults>
</compile_context>

<pallas_src>
import functools

import jax
import jax.numpy as jnp
from jax.experimental import pallas as pl
from jax.experimental.pallas import tpu as pltpu


# ---------------------------------------------------------------------------
# Kernels
# ---------------------------------------------------------------------------

def _simple_kernel(x_ref, o_ref, *, L):
    """One block covers the full reduction axis L; two-pass stats."""
    x = x_ref[...].astype(jnp.float32)
    max_v = jnp.max(x, axis=-1, keepdims=True)
    min_v = jnp.min(x, axis=-1, keepdims=True)
    mean_v = jnp.sum(x, axis=-1, keepdims=True) * (1.0 / float(L))
    if L > 1:
        d = x - mean_v                       # block resident -> 2nd pass ~free
        var_v = jnp.sum(d * d, axis=-1, keepdims=True) * (1.0 / float(L - 1))
        std_v = jnp.sqrt(var_v)
    else:
        # torch.std (unbiased) of a single element is NaN
        std_v = jnp.full_like(mean_v, jnp.nan)
    o_ref[...] = jnp.concatenate(
        [max_v, min_v, mean_v, std_v], axis=-1).astype(o_ref.dtype)


def _lblocked_kernel(x_ref, o_ref, max_sc, min_sc, s1_sc, s2_sc, shift_sc,
                     *, L, tl):
    """Reduction axis tiled over a second ("arbitrary") grid axis.

    Lane-shaped (rt, 128) running max/min/sum/sumsq live in VMEM scratch
    (pure VPU elementwise accumulation per 128-lane chunk).  Sums accumulate
    around a per-row shift (approx. mean of the first chunk) to avoid
    catastrophic cancellation.  Cross-lane reductions + mean/var/std + concat
    happen once, at the last lane block.
    """
    kl = pl.program_id(1)
    nl = pl.num_programs(1)
    rem = L - (nl - 1) * tl                  # valid lanes in the last block

    x = x_ref[...].astype(jnp.float32)       # (rt, tl)

    @pl.when(kl == 0)
    def _init():
        max_sc[...] = jnp.full_like(max_sc, -jnp.inf)
        min_sc[...] = jnp.full_like(min_sc, jnp.inf)
        s1_sc[...] = jnp.zeros_like(s1_sc)
        s2_sc[...] = jnp.zeros_like(s2_sc)
        # per-row shift from the first lane chunk of the first block
        nv = min(128, L)
        c0 = x[:, 0:128]
        if nv < 128:
            lane = jax.lax.broadcasted_iota(jnp.int32, c0.shape, 1)
            c0 = jnp.where(lane < nv, c0, 0.0)
        shift_sc[...] = jnp.sum(c0, axis=-1, keepdims=True) * (1.0 / float(nv))

    def _accum(valid_lanes):
        shift = jnp.broadcast_to(shift_sc[...], max_sc.shape)   # hoisted once
        mx = max_sc[...]
        mn = min_sc[...]
        s1 = s1_sc[...]
        s2 = s2_sc[...]
        full = valid_lanes // 128
        part = valid_lanes - full * 128
        for c in range(full):                # unmasked VPU-only chunks
            xc = x[:, c * 128:(c + 1) * 128]
            mx = jnp.maximum(mx, xc)
            mn = jnp.minimum(mn, xc)
            d = xc - shift
            s1 = s1 + d
            s2 = s2 + d * d
        if part:                             # single partial chunk (last block)
            xc = x[:, full * 128:(full + 1) * 128]
            lane = jax.lax.broadcasted_iota(jnp.int32, xc.shape, 1)
            m = lane < part
            mx = jnp.maximum(mx, jnp.where(m, xc, -jnp.inf))
            mn = jnp.minimum(mn, jnp.where(m, xc, jnp.inf))
            d = jnp.where(m, xc - shift, 0.0)
            s1 = s1 + d
            s2 = s2 + d * d
        max_sc[...] = mx
        min_sc[...] = mn
        s1_sc[...] = s1
        s2_sc[...] = s2

    if rem == tl:
        # L divides evenly into lane blocks: never any masking.
        _accum(tl)
    else:
        @pl.when(kl < nl - 1)
        def _interior():
            _accum(tl)

        @pl.when(kl == nl - 1)
        def _last():
            _accum(rem)

    @pl.when(kl == nl - 1)
    def _finalize():
        max_v = jnp.max(max_sc[...], axis=-1, keepdims=True)
        min_v = jnp.min(min_sc[...], axis=-1, keepdims=True)
        s1 = jnp.sum(s1_sc[...], axis=-1, keepdims=True)
        s2 = jnp.sum(s2_sc[...], axis=-1, keepdims=True)
        mean_v = shift_sc[...] + s1 * (1.0 / float(L))
        if L > 1:
            var_v = jnp.maximum(s2 - s1 * s1 * (1.0 / float(L)), 0.0) * (
                1.0 / float(L - 1))
            std_v = jnp.sqrt(var_v)
        else:
            std_v = jnp.full_like(mean_v, jnp.nan)
        o_ref[...] = jnp.concatenate(
            [max_v, min_v, mean_v, std_v], axis=-1).astype(o_ref.dtype)


# ---------------------------------------------------------------------------
# Wrapper
# ---------------------------------------------------------------------------

def _tpu_budgets():
    """Generation-aware (vmem_limit_bytes, per-tile byte budget)."""
    try:
        cap = int(pltpu.get_tpu_info().vmem_capacity_bytes)
    except Exception:
        cap = 64 * 1024 * 1024               # conservative (v7x per-TC VMEM)
    # v5e/v6e (128 MiB) -> 96 MiB limit, 16 MiB tiles
    # v7x    (64 MiB)   -> 48 MiB limit,  8 MiB tiles
    limit = min((cap * 3) // 4, 96 * 1024 * 1024)
    tile = max(limit // 6, 1 * 1024 * 1024)   # 2x dbl-buffered input + scratch
    return limit, tile


def _choose_row_tile(R, bytes_per_row, sub, tile_budget, min_steps):
    """Row tile: VMEM-budget capped, sublane aligned, >= min_steps grid steps."""
    rt = max(tile_budget // max(bytes_per_row, 1), 1)
    # Keep at least `min_steps` row blocks so DMA/compute overlap and v7x's
    # two TensorCores both get work (never a 1-step serial grid).
    rt = min(rt, max(-(-R // min_steps), 1))
    rt = max((rt // sub) * sub, sub)
    return rt


def feature_extraction(x, *, lane_tile=2048, force_l_block=False,
                       max_tile_bytes=None, vmem_limit_bytes=None):
    """x: any shape (..., L). Returns features of shape (..., 4)."""
    orig_shape = x.shape
    L = int(orig_shape[-1])
    x2d = x.reshape(-1, L)
    R = int(x2d.shape[0])

    itemsize = jnp.dtype(x.dtype).itemsize
    # dtype-aware sublane alignment: f32 -> 8, bf16 -> 16, int8 -> 32
    sub = max(8, 32 // itemsize)

    auto_limit, auto_tile = _tpu_budgets()
    vmem_limit = int(vmem_limit_bytes) if vmem_limit_bytes else auto_limit
    tile_budget = int(max_tile_bytes) if max_tile_bytes else auto_tile

    out_shape = jax.ShapeDtypeStruct((R, 4), x.dtype)

    if (not force_l_block) and (L * itemsize * sub <= tile_budget):
        # ---------------- simple path: full L per block ----------------
        rt = _choose_row_tile(R, L * itemsize, sub, tile_budget, min_steps=8)
        grid = (pl.cdiv(R, rt),)             # ragged last row block is legal
        out2d = pl.pallas_call(
            functools.partial(_simple_kernel, L=L),
            out_shape=out_shape,
            grid_spec=pltpu.PrefetchScalarGridSpec(
                num_scalar_prefetch=0,
                grid=grid,
                in_specs=[pl.BlockSpec((rt, L), lambda i: (i, 0))],
                out_specs=pl.BlockSpec((rt, 4), lambda i: (i, 0)),
            ),
            compiler_params=pltpu.CompilerParams(
                dimension_semantics=("parallel",),
                vmem_limit_bytes=vmem_limit,
            ),
        )(x2d)
    else:
        # -------- L-blocked path: accumulate over lane blocks ----------
        tl = max(128, (int(lane_tile) // 128) * 128)
        tl = min(tl, ((L + 127) // 128) * 128)
        rt = _choose_row_tile(R, tl * itemsize, sub, tile_budget, min_steps=2)
        grid = (pl.cdiv(R, rt), pl.cdiv(L, tl))     # reduction axis last
        out2d = pl.pallas_call(
            functools.partial(_lblocked_kernel, L=L, tl=tl),
            out_shape=out_shape,
            grid_spec=pltpu.PrefetchScalarGridSpec(
                num_scalar_prefetch=0,
                grid=grid,
                in_specs=[pl.BlockSpec((rt, tl), lambda i, k: (i, k))],
                out_specs=pl.BlockSpec((rt, 4), lambda i, k: (i, 0)),
                scratch_shapes=[pltpu.VMEM((rt, 128), jnp.float32)] * 4
                             + [pltpu.VMEM((rt, 1), jnp.float32)],
            ),
            compiler_params=pltpu.CompilerParams(
                dimension_semantics=("parallel", "arbitrary"),
                vmem_limit_bytes=vmem_limit,
            ),
        )(x2d)

    return out2d.reshape(orig_shape[:-1] + (4,))


# ---------------------------------------------------------------------------
# Reference (matches torch semantics: unbiased std)
# ---------------------------------------------------------------------------

def _reference(x):
    L = x.shape[-1]
    xf = x.astype(jnp.float32)
    max_v = jnp.max(xf, axis=-1, keepdims=True)
    min_v = jnp.min(xf, axis=-1, keepdims=True)
    mean_v = jnp.mean(xf, axis=-1, keepdims=True)
    var_v = jnp.sum((xf - mean_v) ** 2, axis=-1, keepdims=True) / (L - 1)
    std_v = jnp.sqrt(var_v)
    return jnp.concatenate([max_v, min_v, mean_v, std_v], axis=-1).astype(x.dtype)


if __name__ == "__main__":
    key = jax.random.PRNGKey(0)
    k1, k2, k3 = jax.random.split(key, 3)

    # Primary: small signal tensor (simple path, full-L blocks, 8-step grid).
    x1 = jax.random.normal(k1, (2, 4, 16, 128), dtype=jnp.float32)
    out1 = jax.block_until_ready(feature_extraction(x1))
    ref1 = _reference(x1)
    assert out1.shape == x1.shape[:-1] + (4,), out1.shape
    assert jnp.allclose(out1, ref1, atol=1e-3, rtol=1e-3), "simple-path mismatch"

    # Secondary: odd R and L (not multiples of 8 / 128), exercising the
    # L-blocked accumulator path with a ragged last lane + row block.
    x2 = 3.0 + 0.5 * jax.random.normal(k2, (3, 5, 300), dtype=jnp.float32)
    out2 = jax.block_until_ready(
        feature_extraction(x2, lane_tile=128, force_l_block=True))
    ref2 = _reference(x2)
    assert out2.shape == x2.shape[:-1] + (4,), out2.shape
    assert jnp.allclose(out2, ref2, atol=1e-3, rtol=1e-3), "L-blocked mismatch"

    # Numerics: |mean| >> std on the L-blocked path (shifted accumulation).
    x3 = 50.0 + 2.0 * jax.random.normal(k3, (7, 9, 700), dtype=jnp.float32)
    out3 = jax.block_until_ready(
        feature_extraction(x3, lane_tile=256, force_l_block=True))
    ref3 = _reference(x3)
    assert out3.shape == x3.shape[:-1] + (4,), out3.shape
    assert jnp.allclose(out3, ref3, atol=1e-3, rtol=1e-3), "shifted-var mismatch"

    print("KERNEL_OK")
</pallas_src>

<mosaic_0001>
module attributes {stable_mosaic.version = 11 : i64} {
  func.func @_simple_kernel(%arg0: i32, %arg1: memref<16x128xf32, #tpu.memory_space<vmem>>, %arg2: memref<16x4xf32, #tpu.memory_space<vmem>>) attributes {dimension_semantics = [#tpu.dimension_semantics<parallel>], iteration_bounds = array<i64: 8>, scalar_prefetch = 0 : i64, scratch_operands = 0 : i64, tpu.core_type = #tpu.core_type<tc>, window_params = [{transform_indices = @transform_0, window_bounds = array<i64: 16, 128>}, {transform_indices = @transform_1, window_bounds = array<i64: 16, 4>}]} {
    %c0 = arith.constant 0 : index
    %c0_0 = arith.constant 0 : index
    %0 = vector.load %arg1[%c0, %c0_0] : memref<16x128xf32, #tpu.memory_space<vmem>>, vector<16x128xf32>
    %cst = arith.constant dense<0xFF800000> : vector<16xf32>
    %1 = vector.multi_reduction <maximumf>, %0, %cst [1] : vector<16x128xf32> to vector<16xf32>
    %2 = vector.shape_cast %1 : vector<16xf32> to vector<16x1xf32>
    %cst_1 = arith.constant dense<0x7F800000> : vector<16xf32>
    %3 = vector.multi_reduction <minimumf>, %0, %cst_1 [1] : vector<16x128xf32> to vector<16xf32>
    %4 = vector.shape_cast %3 : vector<16xf32> to vector<16x1xf32>
    %cst_2 = arith.constant dense<0.000000e+00> : vector<16xf32>
    %5 = vector.multi_reduction <add>, %0, %cst_2 [1] : vector<16x128xf32> to vector<16xf32>
    %6 = vector.shape_cast %5 : vector<16xf32> to vector<16x1xf32>
    %cst_3 = arith.constant 7.812500e-03 : f32
    %7 = vector.broadcast %cst_3 : f32 to vector<16x1xf32>
    %8 = arith.mulf %6, %7 : vector<16x1xf32>
    %9 = vector.broadcast %8 : vector<16x1xf32> to vector<16x128xf32>
    %10 = arith.subf %0, %9 : vector<16x128xf32>
    %11 = arith.mulf %10, %10 : vector<16x128xf32>
    %cst_4 = arith.constant dense<0.000000e+00> : vector<16xf32>
    %12 = vector.multi_reduction <add>, %11, %cst_4 [1] : vector<16x128xf32> to vector<16xf32>
    %13 = vector.shape_cast %12 : vector<16xf32> to vector<16x1xf32>
    %cst_5 = arith.constant 0.00787401571 : f32
    %14 = vector.broadcast %cst_5 : f32 to vector<16x1xf32>
    %15 = arith.mulf %13, %14 : vector<16x1xf32>
    %16 = math.sqrt %15 : vector<16x1xf32>
    %17 = tpu.concatenate %2, %4, %8, %16 in 1 : vector<16x1xf32>, vector<16x1xf32>, vector<16x1xf32>, vector<16x1xf32> -> vector<16x4xf32>
    %c0_6 = arith.constant 0 : index
    %c0_7 = arith.constant 0 : index
    %18 = vector.load %arg2[%c0_6, %c0_7] : memref<16x4xf32, #tpu.memory_space<vmem>>, vector<16x4xf32>
    tpu.vector_store %arg2[%c0_6, %c0_7], %17 {strides = array<i32>} : memref<16x4xf32, #tpu.memory_space<vmem>>, vector<16x4xf32>,
    return
  }
  func.func @transform_0(%arg0: i32) -> (i32, i32) {
    %c0_i32 = arith.constant 0 : i32
    %c0_i32_0 = arith.constant 0 : i32
    return %arg0, %c0_i32 : i32, i32
  }
  func.func @transform_1(%arg0: i32) -> (i32, i32) {
    %c0_i32 = arith.constant 0 : i32
    %c0_i32_0 = arith.constant 0 : i32
    return %arg0, %c0_i32 : i32, i32
  }
}

</mosaic_0001>

<bundles_post_ra>
// kernel: tpu_custom_call.1
= control target key start
LH: loop header
LB: loop body
LE: loop exit
PB: predicated region body
PF: predicated region fallthrough
CT: control target
= control target key end

     0   :  { %6 = vsyncpa [#allocation3], 0  ;;  %s500_s0 = inlined_call_operand.hbm [shape: f32[128,128], index: 0, kind: input, shape index: {}]   ;;  %s501_s1 = inlined_call_operand.vmem [shape: f32[128,4], index: 1, kind: output, shape index: {}]  }
   0x1   :  { %8 = vsyncpa [#allocation3 + $0x1], 0  ;;  %s394_s6 = smov 0   ;;  %s396_s7 = smov 0  }
   0x2   :  { %s398_s8 = smov 0   ;;  %s400_s9 = smov 0  }
   0x3 LB: > { %s258_s10 = sadd.s32 4294967295, %s379_s9   ;;  %s414_s11 = sadd.s32 1, %s379_s9   ;;  %s379_s9 = sphi %s400_s9, %s510_s9   ;;  %s375_s8 = sphi %s398_s8, %s509_s8   ;;  %s371_s7 = sphi %s396_s7, %s508_s7   ;;  %s367_s6 = sphi %s394_s6, %s507_s6  }
   0x4   : > { %s18_s12 = ssub.s32 %s379_s9, %s414_s11  ;;  %s21_s13 = sadd.s32 1, %s375_s8 }
   0x5   : > { %p19_p0 = scmp.eq.s32.totalorder %s18_s12, 0  ;;  %p28_p1 = scmp.ne.s32.totalorder %s375_s8, %s371_s7 }
   0x6   : > { %p29_p2 = scmp.eq.s32.totalorder %s379_s9, 0  ;;  %p34_p3 = scmp.ne.s32.totalorder %s371_s7, %s367_s6 }
   0x7   : > { %s424_s14 = scalar_select %p19_p0, %s375_s8, %s21_s13  }
   0x8   : > { %p30_p4 = por %p29_p2, %p28_p1  ;;  %p35_p5 = scmp.eq.s32.totalorder %s258_s10, 0 }
   0x9   : > { %p278_p6 = scmp.lt.s32.totalorder %s379_s9, 8  ;;  %s84_s16 = sand.u32 1, %s375_s8  }
   0xa   : > { %p429_p7 = por %p35_p5, %p34_p3  ;;  %s262_s17 = sshll.u32 %s84_s16, 4 }
   0xb   : > { %s271_s18 = sshll.u32 %s379_s9, 8  ;;  %s88_s22 = scalar_lea.vmem [#allocation2], %s262_s17 }
   0xc   : > { %s503_s15 = scalar_select %p429_p7, 1, 0 }
   0xd   : > { %s438_s21 = scalar_lea.hbm %s500_s0, %s271_s18  ;;  %s95_s23 = sshll.u32 %s88_s22, 4  ;;  %s440_s23 = int_to_ptr.vmem [resolvable:$true] %s95_s23 }
   0xe   : > { %p442_p8 = pnand %p278_p6, %p30_p4  ;;  %s447_s25 = scalar_lea.sflag [#allocation3], %s84_s16 }
   0xf   : > { %s317_s26 = scalar_lea.hbm %s438_s21, 256  ;;  %s322_s29 = scalar_lea.hbm %s500_s0, 2048 }
  0x10   : > { %p318_p10 = scmp.ne.s32.totalorder %s438_s21, %s317_s26  ;;  %p319_p11 = pneg %p442_p8 }
  0x11   : > { %p323_p0 = scmp.lt.s32.totalorder %s438_s21, %s500_s0  ;;  %p324_p1 = scmp.lt.s32.totalorder %s322_s29, %s317_s26 }
  0x12   : > { %p320_p12 = pnand %p319_p11, %p318_p10 }
  0x13   : > { %p325_p2 = por %p324_p1, %p323_p0 }
  0x14   : > { %p321_p13 = pneg %p320_p12 }
  0x16   : > { %p326_p3 = pnand %p325_p2, %p321_p13 }
  0x18   : > { %329 = shalt.err (!%p326_p3)
}
  0x19   : > { %s330_s3 = scalar_lea.vmem %s440_s23, 256  ;;  %s381_s4 = smov [#allocation2]  }
  0x1a   : > { %p331_p4 = scmp.ne.s32.totalorder %s440_s23, %s330_s3  ;;  %s335_s5 = sshll.u32 %s381_s4, 4  ;;  %s336_s5 = int_to_ptr.vmem [resolvable:$false] %s335_s5 }
  0x1b   : > { %s337_s6 = scalar_lea.vmem %s336_s5, 512  ;;  %p338_p10 = scmp.lt.s32.totalorder %s440_s23, %s336_s5 }
  0x1c   : > { %p333_p5 = pnand %p331_p4, %p319_p11  ;;  %p339_p12 = scmp.lt.s32.totalorder %s337_s6, %s330_s3 }
  0x1e   : > { %p334_p6 = pneg %p333_p5  ;;  %p340_p9 = por %p339_p12, %p338_p10 }
  0x20   : > { %p341_p7 = pnand %p340_p9, %p334_p6 }
  0x22   : > { %344 = shalt.err (!%p341_p7)
}
  0x23   : > { %s382_s12 = smov 128   ;;  %s383_s13 = smov 8  }
  0x24   : > { %277 = dma.hbm_to_vmem [thread:$0]  (!%p442_p8), %s438_s21, 256, %s440_s23, %s447_s25, %s382_s12, %s382_s12, %s383_s13  }
  0x25   : > { %p103_p11 = scmp.lt.s32.totalorder %s379_s9, 9  ;;  %p505_p13 = scmp.ge.s32.totalorder %s379_s9, 1 }
  0x27   : > { %p104_p0 = pnand %p505_p13, %p103_p11 }
  0x28   : > { %s109_s16 = sand.u32 (!%p104_p0), 1, %s371_s7   ;;  %p506_p7 = scmp.ne.s32.totalorder (!%p104_p0), %s503_s15, 0 }
  0x29   : > { %107 = sbr.rel (%p104_p0) target bundleno = 356 (0x164), region = 24  ;;  %s266_s17 = sshll.u32 (!%p104_p0), %s109_s16, 4 }
  0x2a   : > { %s110_s18 = scalar_lea.sflag (!%p104_p0), [#allocation3], %s109_s16  ;;  %s113_s19 = scalar_lea.vmem (!%p104_p0), [#allocation2], %s266_s17 }
  0x2e   : > { %362 = dma.done.wait (%p506_p7), %s110_s18, 256  }
  0x2f   : > { %364 = vsyncadd (%p506_p7), %s110_s18, 4294967040  ;;  %v139_v0 = vld [vmem:[%s113_s19] sm:$0xff]  ;;  %v140_v1 = vld [vmem:[%s113_s19 + $0x8] sm:$0xff]  ;;  %s267_s15 = sshll.u32 %s258_s10, 1  ;;  %vm179_vm0 = vcmask 7168   ;;  %vm182_vm1 = vcmask 15360  }
  0x30   : > { %149 = vadd.xlane.f32.xlu0 %v139_v0  ;;  %p134_p8 = scmp.lt.s32.totalorder %s267_s15, 15  ;;  %vm185_vm3 = vcmask 23552   ;;  %vm188_vm5 = vcmask 31744  }
  0x32   : > { %s512_s15 = smov (!%p134_p8, %s267_s15), 15 }
  0x33   : > { %s268_s20 = sshll.u32 %s512_s15, 3 }
  0x34   : > { %151 = vadd.xlane.f32.xlu0 %v140_v1  ;;  %s137_s10 = scalar_lea.vmem %s501_s1, %s268_s20 }
  0x38   : > { %141 = vmax.xlane.f32.xlu0 %v139_v0 }
  0x3c   : > { %145 = vmin.xlane.f32.xlu0 %v139_v0 }
  0xb9   : > { %v150_v2 = vpop.xlane.xlu0 %149 }
  0xba   : > { %v153_v3 = vmul.f32 0.0078125, %v150_v2 }
  0xbc   : > { %v155_v4 = vsub.f32 %v139_v0, %v153_v3 }
  0xbd   : > { %v152_v5 = vpop.xlane.xlu0 %151 }
  0xbe   : > { %v154_v6 = vmul.f32 0.0078125, %v152_v5  ;;  %v157_v7 = vmul.f32 %v155_v4, %v155_v4 }
  0xc0   : > { %159 = vadd.xlane.f32.xlu1 %v157_v7  ;;  %v156_v8 = vsub.f32 %v140_v1, %v154_v6 }
  0xc1   : > { %v142_v14 = vpop.xlane.xlu0 %141 }
  0xc2   : > { %v158_v9 = vmul.f32 %v156_v8, %v156_v8 }
  0xc4   : > { %161 = vadd.xlane.f32.xlu1 %v158_v9 }
  0xc5   : > { %v146_v16 = vpop.xlane.xlu0 %145 }
  0xc6   : > { %v180_v18 = vsel %vm179_vm0, %v142_v14, %v146_v16 }
  0xc7   : > { %v183_v24 = vsel %vm182_vm1, %v180_v18, %v153_v3 }
  0xc8   : > { %143 = vmax.xlane.f32.xlu1 %v140_v1 }
  0xcc   : > { %147 = vmin.xlane.f32.xlu1 %v140_v1 }
 0x149   : > { %v160_v10 = vpop.xlane.xlu1 %159 }
 0x14a   : > { %v163_v11 = vmul.f32 0.007874016, %v160_v10 }
 0x14c   : > { %313 = vrsqrt.f32 %v163_v11  ;;  %vm167_vm2 = vcmp.eq.f32.partialorder %v163_v11, inf  ;;  %v170_v20 = vand.u32 2147483648, %v163_v11  ;;  %vm169_vm4 = vcmp.eq.f32.partialorder %v163_v11, 0.0 }
 0x14d   : > { %v162_v12 = vpop.xlane.xlu1 %161 }
 0x14e   : > { %v164_v13 = vmul.f32 0.007874016, %v162_v12 }
 0x150   : > { %315 = vrsqrt.f32 %v164_v13  ;;  %vm174_vm6 = vcmp.eq.f32.partialorder %v164_v13, inf  ;;  %v177_v29 = vand.u32 2147483648, %v164_v13  ;;  %vm176_vm7 = vcmp.eq.f32.partialorder %v164_v13, 0.0 }
 0x151   : > { %v144_v15 = vpop.xlane.xlu1 %143 }
 0x155   : > { %v148_v21 = vpop.xlane.xlu1 %147 }
 0x156   : > { %v181_v27 = vsel %vm179_vm0, %v144_v15, %v148_v21 }
 0x157   : > { %v184_v32 = vsel %vm182_vm1, %v181_v27, %v154_v6 }
 0x159   : > { %v314_v17 = vpop.eup %313 }
 0x15a   : > { %v166_v19 = vmul.f32 %v314_v17, %v163_v11 }
 0x15c   : > { %v168_v22 = vsel %vm167_vm2, %v163_v11, %v166_v19 }
 0x15d   : > { %v316_v23 = vpop.eup %315  ;;  %v171_v25 = vsel %vm169_vm4, %v170_v20, %v168_v22 }
 0x15e   : > { %v173_v26 = vmul.f32 %v316_v23, %v164_v13  ;;  %v186_v28 = vsel %vm185_vm3, %v183_v24, %v171_v25 }
 0x15f   : > { %189 = vst.msk [vmem:[%s137_s10] sm:$0xff] %vm188_vm5, %v186_v28 }
 0x160   : > { %v175_v30 = vsel %vm174_vm6, %v164_v13, %v173_v26 }
 0x161   : > { %v178_v31 = vsel %vm176_vm7, %v177_v29, %v175_v30 }
 0x162   : > { %v187_v33 = vsel %vm185_vm3, %v184_v32, %v178_v31 }
 0x163   : > { %190 = vst.msk [vmem:[%s137_s10 + $0x8] sm:$0xff] %vm188_vm5, %v187_v33 }
 0x164 PF: > { %p11_p9 = scmp.ge.s32.totalorder %s414_s11, 10   ;;  %s507_s6 = smov %s371_s7 }
 0x165   : > { %s508_s7 = smov %s375_s8  ;;  %s509_s8 = smov %s424_s14 }
 0x166   : > { %s510_s9 = smov %s414_s11  ;;  %13 = sbr.rel (!%p11_p9) target bundleno = 3 (0x3), region = 64 }
 0x16b   :  { %213 = vsyncpa [#allocation3], 1 }
 0x16c   :  { %215 = vsyncpa [#allocation3 + $0x1], 1 }

</bundles_post_ra>
